<compile_context>
chip_gen: v5e
topology: v5e:2x2
jax: 0.10.0
libtpu: 0.0.40
codegen_flags: <defaults>
</compile_context>

<pallas_src>
import functools
import math

import numpy as np
import jax
import jax.numpy as jnp
from jax.experimental import pallas as pl
from jax.experimental.pallas import tpu as pltpu


def _l2pool_kernel(x_ref, bw2_ref, o_ref, *, Ho, Wo):
    """One block of BT images (BR = BT*Ho rows).

    x_ref  : VMEM (BR, 2*W)   row r = b*Ho + k holds [x[b, 2k, :], x[b, 2k+1, :]]
    bw2_ref: VMEM (2*W, 2*Wo) block-diagonal banded stride-2 filter matrix,
             vertical tap weights pre-multiplied in.
    o_ref  : VMEM (BR, Wo)
    """
    x = x_ref[...].astype(jnp.float32)
    # One MXU matmul does: horizontal 3-tap filter of x**2, the stride-2 column
    # decimation, the conv zero-padding, and the vertical tap scaling.
    tt = jnp.dot(x * x, bw2_ref[...], preferred_element_type=jnp.float32)
    cen = tt[:, :Wo]        # w_v[1] * horiz(x[b, 2k  ]**2)   (centre vertical tap)
    low = tt[:, Wo:]        # w_v[2] * horiz(x[b, 2k+1]**2)   (lower vertical tap)
    acc = cen + low + 1e-12
    if Ho > 1:
        # Upper vertical tap = previous output row's "low" term; it must be zero at
        # each image's first output row (that row's upper tap is the conv zero pad).
        up = jnp.concatenate(
            [jnp.zeros((1, Wo), jnp.float32), low[:-1, :]], axis=0)
        k_in_img = jax.lax.broadcasted_iota(jnp.int32, up.shape, 0) % Ho
        acc = acc + jnp.where(k_in_img == 0, 0.0, up)
    # sqrt(acc) == acc * rsqrt(acc): keeps the transcendental on the EUP slot.
    o_ref[...] = (acc * jax.lax.rsqrt(acc)).astype(o_ref.dtype)


def _build_bw2(W, Wo, w1, stride, padding):
    """Banded stride-2 horizontal filter matrix for the interleaved row-pair layout.

    horiz(y)[o] = sum_j w1[j] * y_padded[stride*o + j]; the zero padding is folded
    into the band bounds.  Lanes [0:W] (even input row) feed output columns [0:Wo]
    scaled by the centre vertical weight, lanes [W:2W] (odd input row) feed columns
    [Wo:2Wo] scaled by the lower/upper vertical weight.
    """
    K = len(w1)
    bw = np.zeros((W, Wo), np.float32)
    for o in range(Wo):
        for j in range(K):
            w = stride * o + j - padding
            if 0 <= w < W:
                bw[w, o] = w1[j]
    bw2 = np.zeros((2 * W, 2 * Wo), np.float32)
    bw2[:W, :Wo] = w1[1] * bw      # even input row  -> centre vertical tap
    bw2[W:, Wo:] = w1[2] * bw      # odd  input row  -> lower (and shifted upper) tap
    return jnp.asarray(bw2)


def _vmem_capacity_bytes():
    try:
        return int(pltpu.get_tpu_info().vmem_capacity_bytes)
    except Exception:
        return 64 * 1024 * 1024    # conservative: safe on every current generation


def _pick_block(nc, ho, w, wo, itemsize):
    """Pick BT (images per grid step) and the VMEM limit, generation-aware."""
    per_img = (2 * ho * 2 * w * itemsize     # input block, double-buffered
               + 2 * ho * wo * itemsize      # output block, double-buffered
               + 2 * ho * 2 * w * 4          # f32 cast + squared slab
               + ho * 2 * wo * 4             # matmul result
               + 5 * ho * wo * 4)            # lane halves / shifted row / mask / acc
    cap = _vmem_capacity_bytes()
    vmem_limit = min(3 * cap // 4, 96 * 1024 * 1024)
    bw2_bytes = 2 * (2 * w) * (2 * wo) * 4   # filter matrix (double-buffered)
    budget = max(per_img, vmem_limit // 2 - bw2_bytes)
    bt = max(1, budget // per_img)
    if nc >= 4:
        bt = min(bt, pl.cdiv(nc, 4))         # keep >= ~4 grid steps in flight
    bt = min(bt, nc)
    if bt < nc:
        mult = 8 // math.gcd(ho, 8)          # 8-sublane alignment of the row blocks
        bt = max(mult, (bt // mult) * mult)
        if bt >= nc:
            bt = nc
        else:
            steps = pl.cdiv(nc, bt)
            if steps > 1 and steps % 2 == 1:
                # Prefer an even step count (balances v7x's two TensorCores).
                alt = pl.cdiv(pl.cdiv(nc, steps + 1), mult) * mult
                if 0 < alt <= bt and pl.cdiv(nc, alt) % 2 == 0:
                    bt = alt
    return int(bt), int(vmem_limit)


def make_l2pooling(filter_size=5, stride=2, channels=None, pad_off=0):
    del pad_off  # accepted for signature parity; unused by the torch module's forward too
    padding = (filter_size - 2) // 2
    # Deterministic parameter init, exactly like the torch module's __init__.
    a = np.hanning(filter_size)[1:-1]
    g = a[:, None] * a[None, :]
    g = g / g.sum()
    w1 = a / a.sum()                 # separable 1-D weights: g == outer(w1, w1)
    K = w1.shape[0]
    assert stride == 2 and K == 3 and np.isclose(w1[0], w1[2]), \
        "kernel specialised to the module defaults (filter_size=5, stride=2)"
    filt = jnp.asarray(g, dtype=jnp.float32)

    def forward(x_nchw):
        N, C, H, W = x_nchw.shape
        if channels is not None:
            assert channels == C
        NC = N * C
        Ho = (H + 2 * padding - K) // stride + 1
        Wo = (W + 2 * padding - K) // stride + 1
        H_eff = 2 * Ho               # == H for even H, == H + 1 for odd H

        x = x_nchw.reshape(NC, H, W)
        if H_eff != H:
            # TODO(synk): odd H costs one HBM copy of the input; fold into the kernel
            # (masked tail row) if this path ever matters.
            x = jnp.pad(x, ((0, 0), (0, H_eff - H), (0, 0)))
        # Free, layout-preserving view: row r = b*Ho + k holds the row pair
        # [x[b, 2k, :], x[b, 2k+1, :]] on the lane axis.  No HBM pre-pass.
        x2d = x.reshape(NC * Ho, 2 * W)

        bw2 = _build_bw2(W, Wo, w1, stride, padding)
        BT, vmem_limit = _pick_block(NC, Ho, W, Wo, x2d.dtype.itemsize)

        kernel = functools.partial(_l2pool_kernel, Ho=Ho, Wo=Wo)
        out2d = pl.pallas_call(
            kernel,
            out_shape=jax.ShapeDtypeStruct((NC * Ho, Wo), x_nchw.dtype),
            grid=(pl.cdiv(NC, BT),),
            in_specs=[
                pl.BlockSpec((BT * Ho, 2 * W), lambda n: (n, 0)),
                pl.BlockSpec((2 * W, 2 * Wo), lambda n: (0, 0)),
            ],
            out_specs=pl.BlockSpec((BT * Ho, Wo), lambda n: (n, 0)),
            compiler_params=pltpu.CompilerParams(
                dimension_semantics=("parallel",),
                vmem_limit_bytes=vmem_limit),
        )(x2d, bw2)
        return out2d.reshape(N, C, Ho, Wo)             # free reshape

    return forward, filt, padding


def _reference(x_nchw, g, stride, padding):
    """Pure-JAX reference matching F.conv2d(groups=C) semantics."""
    N, C, H, W = x_nchw.shape
    x2 = x_nchw.astype(jnp.float32) ** 2
    filt = jnp.broadcast_to(g[None, None, :, :], (C, 1, g.shape[0], g.shape[1]))
    out = jax.lax.conv_general_dilated(
        x2, filt,
        window_strides=(stride, stride),
        padding=[(padding, padding), (padding, padding)],
        dimension_numbers=("NCHW", "OIHW", "NCHW"),
        feature_group_count=C,
        precision=jax.lax.Precision.HIGHEST)
    return jnp.sqrt(out + 1e-12)


if __name__ == "__main__":
    key = jax.random.PRNGKey(0)

    for idx, shape in enumerate([(2, 4, 16, 16), (1, 3, 15, 17)]):
        N, C, H, W = shape
        x = jax.random.normal(jax.random.fold_in(key, idx), shape, dtype=jnp.float32)

        fwd, filt, padding = make_l2pooling(filter_size=5, stride=2, channels=C)
        y = jax.block_until_ready(jax.jit(fwd)(x))

        y_ref = jax.block_until_ready(_reference(x, filt, stride=2, padding=padding))
        assert y.shape == y_ref.shape, (y.shape, y_ref.shape)
        err = float(jnp.max(jnp.abs(y - y_ref)))
        assert err < 1e-4, err

    print("KERNEL_OK")
</pallas_src>

<mosaic_0001>
module attributes {stable_mosaic.version = 11 : i64} {
  func.func @_l2pool_kernel(%arg0: i32, %arg1: memref<16x32xf32, #tpu.memory_space<vmem>>, %arg2: memref<32x16xf32, #tpu.memory_space<vmem>>, %arg3: memref<16x8xf32, #tpu.memory_space<vmem>>) attributes {dimension_semantics = [#tpu.dimension_semantics<parallel>], iteration_bounds = array<i64: 4>, scalar_prefetch = 0 : i64, scratch_operands = 0 : i64, tpu.core_type = #tpu.core_type<tc>, window_params = [{transform_indices = @transform_0, window_bounds = array<i64: 16, 32>}, {pipeline_mode = #tpu.pipeline_mode<synchronous>, transform_indices = @transform_1, window_bounds = array<i64: 32, 16>}, {transform_indices = @transform_2, window_bounds = array<i64: 16, 8>}]} {
    %c0 = arith.constant 0 : index
    %c0_0 = arith.constant 0 : index
    %0 = vector.load %arg1[%c0, %c0_0] : memref<16x32xf32, #tpu.memory_space<vmem>>, vector<16x32xf32>
    %1 = arith.mulf %0, %0 : vector<16x32xf32>
    %c0_1 = arith.constant 0 : index
    %c0_2 = arith.constant 0 : index
    %2 = vector.load %arg2[%c0_1, %c0_2] : memref<32x16xf32, #tpu.memory_space<vmem>>, vector<32x16xf32>
    %cst = arith.constant dense<0.000000e+00> : vector<16x16xf32>
    %3 = tpu.matmul %1, %2, %cst {dimension_numbers = #tpu.dot_dimension_numbers<[1], [0], [0], [1], [0, 0, 1, 1], [], []>} : vector<16x32xf32>, vector<32x16xf32>, vector<16x16xf32> -> vector<16x16xf32>
    %4 = vector.extract_strided_slice %3 {offsets = [0, 0], sizes = [16, 8], strides = [1, 1]} : vector<16x16xf32> to vector<16x8xf32>
    %5 = vector.extract_strided_slice %3 {offsets = [0, 8], sizes = [16, 8], strides = [1, 1]} : vector<16x16xf32> to vector<16x8xf32>
    %6 = arith.addf %4, %5 : vector<16x8xf32>
    %cst_3 = arith.constant 9.99999996E-13 : f32
    %7 = vector.broadcast %cst_3 : f32 to vector<16x8xf32>
    %8 = arith.addf %6, %7 : vector<16x8xf32>
    %cst_4 = arith.constant 0.000000e+00 : f32
    %9 = vector.broadcast %cst_4 : f32 to vector<1x8xf32>
    %10 = vector.extract_strided_slice %5 {offsets = [0, 0], sizes = [15, 8], strides = [1, 1]} : vector<16x8xf32> to vector<15x8xf32>
    %11 = tpu.concatenate %9, %10 in 0 : vector<1x8xf32>, vector<15x8xf32> -> vector<16x8xf32>
    %12 = tpu.iota {dimensions = array<i32: 0>} : vector<16x8xi32>
    %c8_i32 = arith.constant 8 : i32
    %c0_i32 = arith.constant 0 : i32
    %13 = arith.cmpi eq, %c8_i32, %c0_i32 : i32
    %c1_i32 = arith.constant 1 : i32
    %14 = arith.select %13, %c1_i32, %c8_i32 : i32
    %15 = vector.broadcast %14 : i32 to vector<16x8xi32>
    %16 = arith.remsi %12, %15 : vector<16x8xi32>
    %c0_i32_5 = arith.constant 0 : i32
    %17 = vector.broadcast %c0_i32_5 : i32 to vector<16x8xi32>
    %18 = arith.cmpi ne, %16, %17 : vector<16x8xi32>
    %c0_i32_6 = arith.constant 0 : i32
    %19 = vector.broadcast %c0_i32_6 : i32 to vector<16x8xi32>
    %20 = arith.cmpi slt, %16, %19 : vector<16x8xi32>
    %c0_i32_7 = arith.constant 0 : i32
    %21 = arith.cmpi slt, %14, %c0_i32_7 : i32
    %22 = vector.broadcast %21 : i1 to vector<16x8xi1>
    %23 = vector.broadcast %22 : vector<16x8xi1> to vector<16x8xi1>
    %24 = arith.xori %20, %23 : vector<16x8xi1>
    %25 = arith.andi %24, %18 : vector<16x8xi1>
    %26 = vector.broadcast %14 : i32 to vector<16x8xi32>
    %27 = arith.addi %16, %26 : vector<16x8xi32>
    %28 = arith.select %25, %27, %16 : vector<16x8xi1>, vector<16x8xi32>
    %c0_i32_8 = arith.constant 0 : i32
    %29 = vector.broadcast %c0_i32_8 : i32 to vector<16x8xi32>
    %30 = arith.cmpi eq, %28, %29 : vector<16x8xi32>
    %cst_9 = arith.constant 0.000000e+00 : f32
    %31 = vector.broadcast %cst_9 : f32 to vector<16x8xf32>
    %32 = arith.select %30, %31, %11 : vector<16x8xi1>, vector<16x8xf32>
    %33 = arith.addf %8, %32 : vector<16x8xf32>
    %34 = math.rsqrt %33 : vector<16x8xf32>
    %35 = arith.mulf %33, %34 : vector<16x8xf32>
    %c0_10 = arith.constant 0 : index
    %c0_11 = arith.constant 0 : index
    %36 = vector.load %arg3[%c0_10, %c0_11] : memref<16x8xf32, #tpu.memory_space<vmem>>, vector<16x8xf32>
    tpu.vector_store %arg3[%c0_10, %c0_11], %35 {strides = array<i32>} : memref<16x8xf32, #tpu.memory_space<vmem>>, vector<16x8xf32>,
    return
  }
  func.func @transform_0(%arg0: i32) -> (i32, i32) {
    %c0_i32 = arith.constant 0 : i32
    %c0_i32_0 = arith.constant 0 : i32
    return %arg0, %c0_i32 : i32, i32
  }
  func.func @transform_1(%arg0: i32) -> (i32, i32) {
    %c0_i32 = arith.constant 0 : i32
    %c0_i32_0 = arith.constant 0 : i32
    %c0_i32_1 = arith.constant 0 : i32
    return %c0_i32, %c0_i32_0 : i32, i32
  }
  func.func @transform_2(%arg0: i32) -> (i32, i32) {
    %c0_i32 = arith.constant 0 : i32
    %c0_i32_0 = arith.constant 0 : i32
    return %arg0, %c0_i32 : i32, i32
  }
}

</mosaic_0001>

<bundles_post_ra>
// kernel: forward.1
= control target key start
LH: loop header
LB: loop body
LE: loop exit
PB: predicated region body
PF: predicated region fallthrough
CT: control target
= control target key end

     0   :  { %7 = vsyncpa [#allocation3], 0  ;;  %s591_s0 = inlined_call_operand.vmem [shape: f32[64,32], index: 0, kind: input, shape index: {}]   ;;  %s592_s1 = inlined_call_operand.vmem [shape: f32[32,16], index: 1, kind: input, shape index: {}]   ;;  %s593_s2 = inlined_call_operand.hbm [shape: f32[64,8], index: 2, kind: output, shape index: {}]  }
   0x1   :  { %9 = vsyncpa [#allocation3 + $0x1], 0  ;;  %s489_s9 = smov 0   ;;  %s491_s10 = smov 0  }
   0x2   :  { %s493_s11 = smov 0   ;;  %s495_s12 = smov 0  }
   0x3 LB: > { %s510_s13 = sadd.s32 4294967295, %s469_s12   ;;  %s342_s14 = sadd.s32 4294967294, %s469_s12   ;;  %s469_s12 = sphi %s495_s12, %s599_s12   ;;  %s465_s11 = sphi %s493_s11, %s598_s11   ;;  %s461_s10 = sphi %s491_s10, %s597_s10   ;;  %s457_s9 = sphi %s489_s9, %s596_s9  }
   0x4   : > { %s514_s15 = sadd.s32 1, %s469_s12   ;;  %s69_s16 = sadd.s32 1, %s465_s11 }
   0x5   : > { %s66_s17 = ssub.s32 %s469_s12, %s514_s15  ;;  %p79_p0 = scmp.ne.s32.totalorder %s465_s11, %s461_s10 }
   0x6   : > { %p67_p1 = scmp.eq.s32.totalorder %s66_s17, 0  ;;  %p80_p2 = scmp.eq.s32.totalorder %s510_s13, 3 }
   0x7   : > { %p85_p3 = scmp.ne.s32.totalorder %s461_s10, %s457_s9  ;;  %p86_p4 = scmp.eq.s32.totalorder %s342_s14, 3 }
   0x8   : > { %s525_s18 = scalar_select %p67_p1, %s465_s11, %s69_s16  }
   0x9   : > { %p527_p5 = por %p80_p2, %p79_p0  ;;  %p531_p6 = por %p86_p4, %p85_p3 }
   0xa   : > { %p345_p7 = scmp.ge.s32.totalorder %s469_s12, 1  ;;  %p116_p8 = scmp.lt.s32.totalorder %s469_s12, 5 }
   0xc   : > { %p117_p9 = pnand %p345_p7, %p116_p8 }
   0xd   : > { %s347_s25 = sshll.u32 (!%p117_p9), %s510_s13, 1  ;;  %s471_s6 = smov (!%p117_p9), 120  }
   0xe   : > { %120 = sbr.rel (%p117_p9) target bundleno = 306 (0x132), region = 28  ;;  %p139_p10 = scmp.lt.s32.totalorder (!%p117_p9), %s347_s25, 7 }
   0xf   : > { %s135_s7 = sand.u32 (!%p117_p9), 1, %s461_s10   ;;  %s356_s14 = sshll.u32 (!%p117_p9), %s510_s13, 4 }
  0x10   : > { %s346_s8 = sshll.u32 (!%p117_p9), %s135_s7, 4  ;;  %s276_s21 = scalar_lea.hbm (!%p117_p9), %s593_s2, %s356_s14 }
  0x11   : > { %s137_s22 = scalar_lea.vmem (!%p117_p9), [#allocation2], %s346_s8  ;;  %s279_s24 = sshll.u32 (!%p117_p9), %s276_s21, 4  ;;  %s280_s24 = int_to_ptr.hbm [resolvable:$true] %s279_s24 }
  0x12   : > { %s277_s23 = sshll.u32 (!%p117_p9), %s137_s22, 4  ;;  %s265_s13 = scalar_lea.sflag (!%p117_p9), [#allocation3], %s135_s7  ;;  %s278_s23 = int_to_ptr.vmem [resolvable:$true] %s277_s23 }
  0x13   : > { %v152_v0 = vld [vmem:[%s592_s1 + $0x18] sm:$0xff]  ;;  %v151_v1 = vld [vmem:[%s592_s1 + $0x10] sm:$0xff]  ;;  %v150_v2 = vld [vmem:[%s592_s1 + $0x8] sm:$0xff]  ;;  %s601_s25 = smov (!%p139_p10, %s347_s25), 7  ;;  %vm153_vm0 = vcmask 261120   ;;  %vm195_vm1 = vcmask 1040384   ;;  %v206_v13 = vlaneseq }
  0x14   : > { %172 = vmatpush.msra.mxu0 %v152_v0  ;;  %357 = vmatpush.msra.mxu1 %v152_v0  ;;  %v149_v3 = vld [vmem:[%s592_s1] sm:$0xff]  ;;  %s348_s30 = sshll.u32 %s601_s25, 3  ;;  %vm261_vm7 = vcmask 64512   ;;  %s421_s25 = sshra.s32 %s280_s24, 4  ;;  %s422_s25 = int_to_ptr.hbm [resolvable:$true] %s421_s25 }
  0x15   : > { %s142_s5 = scalar_lea.vmem %s591_s0, %s348_s30  ;;  %v207_v14 = vshrl.u32 %v206_v13, 7  ;;  %s423_s26 = scalar_lea.hbm %s422_s25, 16 }
  0x16   : > { %173 = vmatpush.msra.mxu0 %v151_v1  ;;  %358 = vmatpush.msra.mxu1 %v151_v1  ;;  %v145_v4 = vld [vmem:[%s142_s5] sm:$0xff]  ;;  %v146_v5 = vld [vmem:[%s142_s5 + $0x8] sm:$0xff]  ;;  %p424_p11 = scmp.ne.s32.totalorder %s422_s25, %s423_s26  ;;  %s427_s29 = scalar_lea.hbm %s593_s2, 64 }
  0x17   : > { %v147_v6 = vmul.f32 %v145_v4, %v145_v4  ;;  %v148_v7 = vmul.f32 %v146_v5, %v146_v5  ;;  %v213_v15 = vand.u32 7, %v207_v14  ;;  %v208_v17 = vadd.s32 8, %v207_v14  ;;  %p428_p0 = scmp.lt.s32.totalorder %s422_s25, %s593_s2  ;;  %p429_p1 = scmp.lt.s32.totalorder %s427_s29, %s423_s26 }
  0x18   : > { %174 = vmatpush.msra.mxu0 %v150_v2  ;;  %359 = vmatpush.msra.mxu1 %v150_v2  ;;  %p425_p12 = pnand %p424_p11, %p527_p5 }
  0x19   : > { %vm233_vm2 = vcmp.eq.s32.totalorder %v213_v15, 0  ;;  %v220_v23 = vand.u32 7, %v208_v17  ;;  %p430_p2 = por %p429_p1, %p428_p0 }
  0x1a   : > { %175 = vmatpush.msra.mxu0 %v149_v3  ;;  %360 = vmatpush.msra.mxu1 %v149_v3  ;;  %p426_p13 = pneg %p425_p12 }
  0x1b   : > { %349 = vmatmul.msk.f32.vlgmr.msra.gmra.mxu0 %vm153_vm0, %v147_v6  ;;  %350 = vmatmul.msk.f32.vlgmr.msra.gmra.mxu1 %vm153_vm0, %v148_v7  ;;  %vm234_vm3 = vcmp.eq.s32.totalorder %v220_v23, 0 }
  0x1c   : > { %p431_p3 = pnand %p430_p2, %p426_p13 }
  0x98   : > { %v177_v8 = vpop.f32.mrf.mxu0  ;;  %v180_v10 = vpop.f32.mrf.mxu1 }
  0x99   : > { %185 = vrot.lane.b32.xlu0 %v177_v8, %s471_s6  ;;  %v196_v9 = vrot.slane %v177_v8, 7  ;;  %v197_v11 = vrot.slane %v180_v10, 7 }
  0x9b   : > { %199 = vrot.lane.b32.xlu1 %v196_v9, %s471_s6  ;;  %v198_v12 = vsel %vm195_vm1, %v196_v9, %v197_v11 }
  0xa1   : > { %187 = vrot.lane.b32.xlu0 %v180_v10, %s471_s6 }
  0xa3   : > { %201 = vrot.lane.b32.xlu1 %v198_v12, %s471_s6 }
 0x10b   : > { %v186_v16 = vpop.permute.xlu0 %185 }
 0x10c   : > { %v191_v18 = vadd.f32 %v186_v16, %v177_v8 }
 0x10d   : > { %v200_v19 = vpop.permute.xlu1 %199 }
 0x10e   : > { %v193_v20 = vadd.f32 1e-12, %v191_v18  ;;  %v205_v21 = vsel %vm195_vm1, 0.0, %v200_v19 }
 0x10f   : > { %v235_v22 = vsel %vm233_vm2, 0.0, %v205_v21 }
 0x110   : > { %v237_v24 = vadd.f32 %v235_v22, %v193_v20 }
 0x112   : > { %403 = vrsqrt.f32 %v237_v24  ;;  %vm245_vm5 = vweird.f32 %v237_v24 }
 0x113   : > { %v188_v25 = vpop.permute.xlu0 %187 }
 0x114   : > { %v192_v26 = vadd.f32 %v188_v25, %v180_v10 }
 0x115   : > { %v202_v27 = vpop.permute.xlu1 %201 }
 0x116   : > { %v194_v28 = vadd.f32 1e-12, %v192_v26  ;;  %v236_v29 = vsel %vm234_vm3, 0.0, %v202_v27 }
 0x118   : > { %v404_v30 = vpop.eup %403  ;;  %v238_v31 = vadd.f32 %v236_v29, %v194_v28 }
 0x119   : > { %v240_v32 = vmul.f32 %v404_v30, %v237_v24  ;;  %vm246_vm4 = vweird.f32 %v404_v30 }
 0x11a   : > { %405 = vrsqrt.f32 %v238_v31  ;;  %vm247_vm6 = vmor %vm245_vm5, %vm246_vm4  ;;  %vm255_vm9 = vweird.f32 %v238_v31 }
 0x11b   : > { %v241_v33 = vmul.f32 %v404_v30, %v240_v32 }
 0x11d   : > { %v242_v34 = vmul.f32 0.5, %v241_v33 }
 0x11f   : > { %v243_v35 = vsub.f32 1.5, %v242_v34 }
 0x120   : > { %v406_v36 = vpop.eup %405 }
 0x121   : > { %v244_v37 = vmul.f32 %v404_v30, %v243_v35  ;;  %v250_v38 = vmul.f32 %v406_v36, %v238_v31  ;;  %vm256_vm8 = vweird.f32 %v406_v36 }
 0x122   : > { %vm257_vm10 = vmor %vm255_vm9, %vm256_vm8 }
 0x123   : > { %v248_v39 = vsel %vm247_vm6, %v404_v30, %v244_v37  ;;  %v251_v40 = vmul.f32 %v406_v36, %v250_v38 }
 0x124   : > { %v259_v41 = vmul.f32 %v248_v39, %v237_v24 }
 0x125   : > { %v252_v42 = vmul.f32 0.5, %v251_v40 }
 0x126   : > { %262 = vst.msk [vmem:[%s137_s22] sm:$0xff] %vm261_vm7, %v259_v41 }
 0x127   : > { %v253_v43 = vsub.f32 1.5, %v252_v42 }
 0x129   : > { %v254_v44 = vmul.f32 %v406_v36, %v253_v43 }
 0x12b   : > { %v258_v45 = vsel %vm257_vm10, %v406_v36, %v254_v44 }
 0x12c   : > { %v260_v46 = vmul.f32 %v258_v45, %v238_v31 }
 0x12e   : > { %263 = vst.msk [vmem:[%s137_s22 + $0x8] sm:$0xff] %vm261_vm7, %v260_v46 }
 0x12f   : > { %434 = shalt.err (!%p431_p3)
}
 0x130   : > { %s472_s4 = smov 128   ;;  %s473_s5 = smov 8  }
 0x131   : > { %361 = dma.vmem_to_hbm [thread:$0]  (%p527_p5), %s278_s23, 256, %s280_s24, %s265_s13, %s472_s4, %s472_s4, %s473_s5  }
 0x132 PF: > { %p367_p4 = scmp.ge.s32.totalorder %s469_s12, 2  ;;  %s294_s6 = sand.u32 1, %s457_s9  }
 0x133   : > { %s295_s7 = scalar_lea.sflag [#allocation3], %s294_s6 }
 0x134   : > { %p364_p7 = pnand %p367_p4, %p531_p6 }
 0x136   : > { %p365_p8 = pneg %p364_p7 }
 0x138   : > { %452 = dma.done.wait (%p365_p8), %s295_s7, 256  }
 0x139   : > { %454 = vsyncadd (%p365_p8), %s295_s7, 4294967040  ;;  %p12_p9 = scmp.ge.s32.totalorder %s514_s15, 6   ;;  %s596_s9 = smov %s461_s10 }
 0x13a   : > { %s597_s10 = smov %s465_s11  ;;  %s598_s11 = smov %s525_s18 }
 0x13b   : > { %s599_s12 = smov %s514_s15  ;;  %14 = sbr.rel (!%p12_p9) target bundleno = 3 (0x3), region = 63 }
 0x140   :  { %301 = vsyncpa [#allocation3], 1 }
 0x141   :  { %303 = vsyncpa [#allocation3 + $0x1], 1 }

</bundles_post_ra>
